<compile_context>
chip_gen: v7x
topology: tpu7x:2x2x1
jax: 0.10.0
libtpu: 0.0.40
codegen_flags: <defaults>
</compile_context>

<pallas_src>
import functools
import math

import jax
import jax.numpy as jnp
from jax.experimental import pallas as pl
from jax.experimental.pallas import tpu as pltpu

_EPS = 1e-5  # PyTorch LayerNorm default (folded into the precomputed qxx row).


def _rel_pos_kernel(g_ref, cn_ref, cw_ref, e_ref, o_ref, *, y_scale):
    """One (row-tile, lane-block) step of the packed (H, W*F) output.

    g_ref : SMEM (3,)        y-y block of the Gram form: [Gc00, Gc01, Gc11]
    cn_ref: VMEM (3, Wb)     narrow per-pixel consts for this lane block:
                               0: u0(x) = 2*(Gc02*cx0 + Gc03*cx1)
                               1: u1(x) = 2*(Gc12*cx0 + Gc13*cx1)
                               2: qxx(x) + eps
    cw_ref: VMEM (4, Wb*F)   wide per-lane consts (one image row packed per row):
                               0: centered, gamma-folded cos(y) weight row (tiled per pixel)
                               1: centered, gamma-folded sin(y) weight row (tiled per pixel)
                               2: x-dependent projection cx0*Wgc[2] + cx1*Wgc[3]
                               3: beta (tiled per pixel)
    e_ref : VMEM (Wb, Wb*F)  one-hot expansion E[p, p*F + f] = 1 (whole-array resident)
    o_ref : VMEM (th, Wb*F)  output tile
    """
    i = pl.program_id(0)                      # row-tile index (axis 1 is the lane block)
    th = o_ref.shape[0]

    # y trig coefficients for the image rows of this tile (tiny (th, 1) work).
    y_idx = jax.lax.broadcasted_iota(jnp.int32, (th, 1), 0) + i * th
    y_r = y_idx.astype(jnp.float32) * y_scale
    cy0 = jnp.cos(y_r)                        # (th, 1)
    cy1 = jnp.sin(y_r)                        # (th, 1)

    # ---- narrow path: LayerNorm variance + inverse std at per-pixel width ----
    g00 = g_ref[0]
    g01 = g_ref[1]
    g11 = g_ref[2]
    qyy = (cy0 * cy0) * g00 + (2.0 * cy0 * cy1) * g01 + (cy1 * cy1) * g11  # (th, 1)
    u0 = cn_ref[0:1, :]
    u1 = cn_ref[1:2, :]
    qxx = cn_ref[2:3, :]                      # eps already folded in by the wrapper
    var = qyy + cy0 * u0 + cy1 * u1 + qxx     # (th, Wb)  closed-form var + eps
    inv_std = jax.lax.rsqrt(var)              # (th, Wb)  EUP at 1/F of full width

    # Expand the per-pixel inverse std across the F lanes of each pixel with a
    # one-hot matmul on the otherwise idle MXU (exact under HIGHEST precision).
    inv_full = jnp.dot(inv_std, e_ref[...],
                       preferred_element_type=jnp.float32,
                       precision=jax.lax.Precision.HIGHEST)   # (th, Wb*F)

    # ---- wide path: ~6 f32 VPU ops per stored element ----
    wy0 = cw_ref[0:1, :]
    wy1 = cw_ref[1:2, :]
    xpart = cw_ref[2:3, :]
    beta = cw_ref[3:4, :]
    d_g = cy0 * wy0 + cy1 * wy1 + xpart       # centered, gamma-folded projection
    o_ref[...] = (d_g * inv_full + beta).astype(o_ref.dtype)


def _pick_tiles(H, W, F, target_bytes=2 << 20, min_steps=8):
    """Pick (rows_per_tile, pixels_per_lane_block, num_lane_blocks).

    - Lane (pixel) blocking: a single block spans the whole packed row when
      W <= 128; otherwise 128-pixel blocks keep every block 128-lane aligned
      and bound the one-hot expansion matrix (and the tile) regardless of W.
    - Row tiling: fill ~target_bytes per output tile but keep >= min_steps total
      grid steps (>= 4 per v7x TensorCore) so writeback overlaps compute;
      non-final row blocks are sublane (8) aligned.
    """
    wb = W if W <= 128 else 128
    nlb = -(-W // wb)
    blk_row_bytes = wb * F * 4

    th = max(1, target_bytes // blk_row_bytes)
    row_tiles_wanted = max(1, -(-min_steps // nlb))
    th = min(th, max(1, H // row_tiles_wanted))
    if th >= H:
        return H, wb, nlb
    th = (th // 8) * 8
    if th == 0:
        th = H if H <= 8 else 8
    return th, wb, nlb


def rel_position_embedding(tensor, fc_weight, gamma, beta, *,
                           out_dtype=jnp.float32, target_tile_bytes=2 << 20):
    """Pallas implementation of RelPositionEmbedding.forward (pos_norm=True).

    tensor:    (B, C, H, W)  -- only H, W are used (matches the PyTorch module)
    fc_weight: (F, 4)        -- nn.Linear(4, F, bias=False).weight
    gamma:     (F,)          -- LayerNorm weight
    beta:      (F,)          -- LayerNorm bias
    returns:   (H*W, F) in `out_dtype` (float32 by default; bf16 is an opt-in
               store-bandwidth optimization for v5e).
    """
    _, _, H, W = tensor.shape
    F = fc_weight.shape[0]
    WF = W * F

    w_t = jnp.asarray(fc_weight, jnp.float32).T                      # (4, F)
    gamma = jnp.asarray(gamma, jnp.float32)
    beta = jnp.asarray(beta, jnp.float32)

    # Fold the LayerNorm centering into the weight rows; Gram form for variance.
    wc = w_t - jnp.mean(w_t, axis=1, keepdims=True)                  # (4, F)
    gc = jnp.einsum("kf,lf->kl", wc, wc,
                    precision=jax.lax.Precision.HIGHEST) / float(F)  # (4, 4)
    wgc = wc * gamma[None, :]                                        # gamma folded

    # x-direction trig coefficients.  NOTE: W == 1 (or H == 1) reproduces the
    # PyTorch 0/0 -> NaN behaviour on purpose.
    x_scale = (math.pi / float(W - 1)) if W > 1 else float("nan")
    x_r = jnp.arange(W, dtype=jnp.float32) * x_scale
    cx0 = jnp.cos(x_r)                                               # (W,)
    cx1 = jnp.sin(x_r)                                               # (W,)

    th, wb, nlb = _pick_tiles(H, W, F, target_tile_bytes)
    lb = wb * F                                                      # lanes per block

    # Wide per-lane table (4, W*F).  For fully unmasked stores (W*F) % 128 == 0
    # is required (holds for the demo: 16 * 64 = 1024).
    wide = jnp.stack([
        jnp.tile(wgc[0], W),
        jnp.tile(wgc[1], W),
        (cx0[:, None] * wgc[2][None, :]
         + cx1[:, None] * wgc[3][None, :]).reshape(WF),
        jnp.tile(beta, W),
    ], axis=0)                                                       # (4, WF)

    # Narrow per-pixel table (3, nlb*wb): eps folded into qxx; padded pixels get
    # a benign variance of 1 so rsqrt stays finite (their outputs are masked).
    u0 = 2.0 * (gc[0, 2] * cx0 + gc[0, 3] * cx1)
    u1 = 2.0 * (gc[1, 2] * cx0 + gc[1, 3] * cx1)
    qxx = (gc[2, 2] * cx0 * cx0 + 2.0 * gc[2, 3] * cx0 * cx1
           + gc[3, 3] * cx1 * cx1) + _EPS
    narrow = jnp.stack([u0, u1, qxx], axis=0)                        # (3, W)
    w_pad = nlb * wb
    if w_pad != W:
        pad = jnp.concatenate([jnp.zeros((2, w_pad - W), jnp.float32),
                               jnp.ones((1, w_pad - W), jnp.float32)], axis=0)
        narrow = jnp.concatenate([narrow, pad], axis=1)              # (3, w_pad)

    # One-hot expansion matrix E[p, p*F + f] = 1 (exact per-pixel lane-group
    # broadcast on the MXU).  Size wb*wb*F*4 bytes <= 64 KiB * F.
    expand = jnp.repeat(jnp.eye(wb, dtype=jnp.float32), F, axis=1)   # (wb, wb*F)

    g_sm = jnp.stack([gc[0, 0], gc[0, 1], gc[1, 1]])                 # (3,) -> SMEM

    y_scale = (math.pi / float(H - 1)) if H > 1 else float("nan")
    kernel = functools.partial(_rel_pos_kernel, y_scale=y_scale)

    grid = (pl.cdiv(H, th), nlb)
    out = pl.pallas_call(
        kernel,
        out_shape=jax.ShapeDtypeStruct((H, WF), out_dtype),
        grid_spec=pltpu.PrefetchScalarGridSpec(
            num_scalar_prefetch=0,
            grid=grid,
            in_specs=[
                pl.BlockSpec(memory_space=pltpu.MemorySpace.SMEM),   # Gram scalars
                pl.BlockSpec((3, wb), lambda i, j: (0, j)),          # narrow per-pixel
                pl.BlockSpec((4, lb), lambda i, j: (0, j)),          # wide per-lane
                pl.BlockSpec(memory_space=pltpu.MemorySpace.VMEM),   # one-hot expand
            ],
            out_specs=pl.BlockSpec((th, lb), lambda i, j: (i, j)),
        ),
        compiler_params=pltpu.CompilerParams(
            dimension_semantics=("parallel", "parallel")),
    )(g_sm, narrow, wide, expand)

    # Free row-major view: (H, W*F) -> (H*W, F).
    return out.reshape(H * W, F)


def _reference(tensor, fc_weight, gamma, beta):
    """Pure-JAX reference mirroring the PyTorch forward."""
    _, _, H, W = tensor.shape
    y_range = jnp.arange(H, dtype=jnp.float32) / float(H - 1)
    y_axis = jnp.stack((jnp.cos(y_range * math.pi),
                        jnp.sin(y_range * math.pi)), axis=1)
    y_axis = jnp.tile(y_axis.reshape(H, 1, 2), (1, W, 1)).reshape(H * W, 2)
    x_range = jnp.arange(W, dtype=jnp.float32) / float(W - 1)
    x_axis = jnp.stack((jnp.cos(x_range * math.pi),
                        jnp.sin(x_range * math.pi)), axis=1)
    x_axis = jnp.tile(x_axis.reshape(1, W, 2), (H, 1, 1)).reshape(H * W, 2)
    x_pos = jnp.concatenate((y_axis, x_axis), axis=1)                # (HW, 4)
    x_pos = jnp.dot(x_pos, fc_weight.T,
                    precision=jax.lax.Precision.HIGHEST)             # (HW, F)
    mu = jnp.mean(x_pos, axis=-1, keepdims=True)
    var = jnp.mean((x_pos - mu) ** 2, axis=-1, keepdims=True)
    return (x_pos - mu) * jax.lax.rsqrt(var + _EPS) * gamma + beta


if __name__ == "__main__":
    key = jax.random.PRNGKey(0)
    k_x, k_w, k_g, k_b = jax.random.split(key, 4)

    B, C, H, W = 2, 4, 16, 16
    num_pos_feats = 64

    # Example input (only its shape matters, like the PyTorch module).
    x = jax.random.normal(k_x, (B, C, H, W), dtype=jnp.float32)

    # Deterministic parameters (nn.Linear init range; non-trivial LN affine to
    # exercise the gamma/beta folding).
    bound = 1.0 / math.sqrt(4.0)
    fc_weight = jax.random.uniform(
        k_w, (num_pos_feats, 4), jnp.float32, minval=-bound, maxval=bound)
    gamma = 1.0 + 0.1 * jax.random.normal(k_g, (num_pos_feats,), jnp.float32)
    beta = 0.05 * jax.random.normal(k_b, (num_pos_feats,), jnp.float32)

    out = rel_position_embedding(x, fc_weight, gamma, beta)
    out = jax.block_until_ready(out)

    ref = _reference(x, fc_weight, gamma, beta)
    assert out.shape == (H * W, num_pos_feats)
    assert out.dtype == jnp.float32
    max_err = float(jnp.max(jnp.abs(out - ref)))
    assert jnp.allclose(out, ref, atol=5e-5, rtol=5e-5), max_err

    print("KERNEL_OK")
</pallas_src>

<mosaic_0001>
module attributes {stable_mosaic.version = 11 : i64} {
  func.func @_rel_pos_kernel(%arg0: i32, %arg1: i32, %arg2: memref<3xf32, #tpu.memory_space<smem>>, %arg3: memref<3x16xf32, #tpu.memory_space<vmem>>, %arg4: memref<4x1024xf32, #tpu.memory_space<vmem>>, %arg5: memref<16x1024xf32, #tpu.memory_space<vmem>>, %arg6: memref<8x1024xf32, #tpu.memory_space<vmem>>) attributes {dimension_semantics = [#tpu.dimension_semantics<parallel>, #tpu.dimension_semantics<parallel>], iteration_bounds = array<i64: 2, 1>, scalar_prefetch = 0 : i64, scratch_operands = 0 : i64, tpu.core_type = #tpu.core_type<tc>, window_params = [{transform_indices = @transform_0, window_bounds = array<i64: 3>}, {transform_indices = @transform_1, window_bounds = array<i64: 3, 16>}, {transform_indices = @transform_2, window_bounds = array<i64: 4, 1024>}, {pipeline_mode = #tpu.pipeline_mode<synchronous>, transform_indices = @transform_3, window_bounds = array<i64: 16, 1024>}, {transform_indices = @transform_4, window_bounds = array<i64: 8, 1024>}]} {
    %0 = tpu.iota {dimensions = array<i32: 0>} : vector<8x1xi32>
    %c8_i32 = arith.constant 8 : i32
    %1 = arith.muli %arg0, %c8_i32 : i32
    %2 = vector.broadcast %1 : i32 to vector<8x1xi32>
    %3 = arith.addi %0, %2 : vector<8x1xi32>
    %4 = arith.sitofp %3 : vector<8x1xi32> to vector<8x1xf32>
    %cst = arith.constant 0.209439516 : f32
    %5 = vector.broadcast %cst : f32 to vector<8x1xf32>
    %6 = arith.mulf %4, %5 : vector<8x1xf32>
    %7 = math.cos %6 : vector<8x1xf32>
    %8 = math.sin %6 : vector<8x1xf32>
    %c0 = arith.constant 0 : index
    %9 = memref.load %arg2[%c0] : memref<3xf32, #tpu.memory_space<smem>>
    %c1 = arith.constant 1 : index
    %10 = memref.load %arg2[%c1] : memref<3xf32, #tpu.memory_space<smem>>
    %c2 = arith.constant 2 : index
    %11 = memref.load %arg2[%c2] : memref<3xf32, #tpu.memory_space<smem>>
    %12 = arith.mulf %7, %7 : vector<8x1xf32>
    %13 = vector.broadcast %9 : f32 to vector<8x1xf32>
    %14 = arith.mulf %12, %13 : vector<8x1xf32>
    %cst_0 = arith.constant 2.000000e+00 : f32
    %15 = vector.broadcast %cst_0 : f32 to vector<8x1xf32>
    %16 = arith.mulf %15, %7 : vector<8x1xf32>
    %17 = arith.mulf %16, %8 : vector<8x1xf32>
    %18 = vector.broadcast %10 : f32 to vector<8x1xf32>
    %19 = arith.mulf %17, %18 : vector<8x1xf32>
    %20 = arith.addf %14, %19 : vector<8x1xf32>
    %21 = arith.mulf %8, %8 : vector<8x1xf32>
    %22 = vector.broadcast %11 : f32 to vector<8x1xf32>
    %23 = arith.mulf %21, %22 : vector<8x1xf32>
    %24 = arith.addf %20, %23 : vector<8x1xf32>
    %c0_1 = arith.constant 0 : index
    %c0_2 = arith.constant 0 : index
    %25 = vector.load %arg3[%c0_1, %c0_2] : memref<3x16xf32, #tpu.memory_space<vmem>>, vector<1x16xf32>
    %c1_3 = arith.constant 1 : index
    %c0_4 = arith.constant 0 : index
    %26 = vector.load %arg3[%c1_3, %c0_4] : memref<3x16xf32, #tpu.memory_space<vmem>>, vector<1x16xf32>
    %c2_5 = arith.constant 2 : index
    %c0_6 = arith.constant 0 : index
    %27 = vector.load %arg3[%c2_5, %c0_6] : memref<3x16xf32, #tpu.memory_space<vmem>>, vector<1x16xf32>
    %28 = vector.broadcast %7 : vector<8x1xf32> to vector<8x16xf32>
    %29 = vector.broadcast %25 : vector<1x16xf32> to vector<8x16xf32>
    %30 = arith.mulf %28, %29 : vector<8x16xf32>
    %31 = vector.broadcast %24 : vector<8x1xf32> to vector<8x16xf32>
    %32 = arith.addf %31, %30 : vector<8x16xf32>
    %33 = vector.broadcast %8 : vector<8x1xf32> to vector<8x16xf32>
    %34 = vector.broadcast %26 : vector<1x16xf32> to vector<8x16xf32>
    %35 = arith.mulf %33, %34 : vector<8x16xf32>
    %36 = arith.addf %32, %35 : vector<8x16xf32>
    %37 = vector.broadcast %27 : vector<1x16xf32> to vector<8x16xf32>
    %38 = arith.addf %36, %37 : vector<8x16xf32>
    %39 = math.rsqrt %38 : vector<8x16xf32>
    %c0_7 = arith.constant 0 : index
    %c0_8 = arith.constant 0 : index
    %40 = vector.load %arg5[%c0_7, %c0_8] : memref<16x1024xf32, #tpu.memory_space<vmem>>, vector<16x1024xf32>
    %cst_9 = arith.constant dense<0.000000e+00> : vector<8x1024xf32>
    %41 = tpu.matmul %39, %40, %cst_9 {dimension_numbers = #tpu.dot_dimension_numbers<[1], [0], [0], [1], [0, 0, 1, 1], [], []>, precision = #tpu.contract_precision<fp32>} : vector<8x16xf32>, vector<16x1024xf32>, vector<8x1024xf32> -> vector<8x1024xf32>
    %c0_10 = arith.constant 0 : index
    %c0_11 = arith.constant 0 : index
    %42 = vector.load %arg4[%c0_10, %c0_11] : memref<4x1024xf32, #tpu.memory_space<vmem>>, vector<1x1024xf32>
    %c1_12 = arith.constant 1 : index
    %c0_13 = arith.constant 0 : index
    %43 = vector.load %arg4[%c1_12, %c0_13] : memref<4x1024xf32, #tpu.memory_space<vmem>>, vector<1x1024xf32>
    %c2_14 = arith.constant 2 : index
    %c0_15 = arith.constant 0 : index
    %44 = vector.load %arg4[%c2_14, %c0_15] : memref<4x1024xf32, #tpu.memory_space<vmem>>, vector<1x1024xf32>
    %c3 = arith.constant 3 : index
    %c0_16 = arith.constant 0 : index
    %45 = vector.load %arg4[%c3, %c0_16] : memref<4x1024xf32, #tpu.memory_space<vmem>>, vector<1x1024xf32>
    %46 = vector.broadcast %7 : vector<8x1xf32> to vector<8x1024xf32>
    %47 = vector.broadcast %42 : vector<1x1024xf32> to vector<8x1024xf32>
    %48 = arith.mulf %46, %47 : vector<8x1024xf32>
    %49 = vector.broadcast %8 : vector<8x1xf32> to vector<8x1024xf32>
    %50 = vector.broadcast %43 : vector<1x1024xf32> to vector<8x1024xf32>
    %51 = arith.mulf %49, %50 : vector<8x1024xf32>
    %52 = arith.addf %48, %51 : vector<8x1024xf32>
    %53 = vector.broadcast %44 : vector<1x1024xf32> to vector<8x1024xf32>
    %54 = arith.addf %52, %53 : vector<8x1024xf32>
    %55 = arith.mulf %54, %41 : vector<8x1024xf32>
    %56 = vector.broadcast %45 : vector<1x1024xf32> to vector<8x1024xf32>
    %57 = arith.addf %55, %56 : vector<8x1024xf32>
    %c0_17 = arith.constant 0 : index
    %c0_18 = arith.constant 0 : index
    %58 = vector.load %arg6[%c0_17, %c0_18] : memref<8x1024xf32, #tpu.memory_space<vmem>>, vector<8x1024xf32>
    tpu.vector_store %arg6[%c0_17, %c0_18], %57 {strides = array<i32>} : memref<8x1024xf32, #tpu.memory_space<vmem>>, vector<8x1024xf32>,
    return
  }
  func.func @transform_0(%arg0: i32, %arg1: i32) -> i32 {
    %c0_i32 = arith.constant 0 : i32
    %c0_i32_0 = arith.constant 0 : i32
    return %c0_i32 : i32
  }
  func.func @transform_1(%arg0: i32, %arg1: i32) -> (i32, i32) {
    %c0_i32 = arith.constant 0 : i32
    %c0_i32_0 = arith.constant 0 : i32
    return %c0_i32, %arg1 : i32, i32
  }
  func.func @transform_2(%arg0: i32, %arg1: i32) -> (i32, i32) {
    %c0_i32 = arith.constant 0 : i32
    %c0_i32_0 = arith.constant 0 : i32
    return %c0_i32, %arg1 : i32, i32
  }
  func.func @transform_3(%arg0: i32, %arg1: i32) -> (i32, i32) {
    %c0_i32 = arith.constant 0 : i32
    %c0_i32_0 = arith.constant 0 : i32
    %c0_i32_1 = arith.constant 0 : i32
    return %c0_i32, %c0_i32_0 : i32, i32
  }
  func.func @transform_4(%arg0: i32, %arg1: i32) -> (i32, i32) {
    %c0_i32 = arith.constant 0 : i32
    return %arg0, %arg1 : i32, i32
  }
}

</mosaic_0001>

<bundles_post_ra>
// kernel: tpu_custom_call.1
= control target key start
LH: loop header
LB: loop body
LE: loop exit
PB: predicated region body
PF: predicated region fallthrough
CT: control target
= control target key end

     0   :  { %s3925_s0 = inlined_call_operand.hbm [shape: f32[3], index: 0, kind: input, shape index: {}]   ;;  %s3926_s1 = inlined_call_operand.hbm [shape: f32[3,16], index: 1, kind: input, shape index: {}]   ;;  %s3927_s2 = inlined_call_operand.hbm [shape: f32[4,1024], index: 2, kind: input, shape index: {}]   ;;  %s3928_s3 = inlined_call_operand.hbm [shape: f32[16,1024], index: 3, kind: input, shape index: {}]   ;;  %s3929_s4 = inlined_call_operand.hbm [shape: f32[16,1024], index: 4, kind: output, shape index: {}]  }
   0x1   :  { %3934 = sst [smem:[#allocation15_spill]] %s3927_s2 }
   0x2   :  { %9 = vsyncpa [#allocation5], 0 }
   0x3   :  { %10 = vsyncpa [#allocation3], 0 }
   0x4   :  { %11 = vsyncpa [#allocation8], 0 }
   0x5   :  { %12 = vsyncpa [#allocation4], 0 }
   0x6   :  { %14 = vsyncpa [#allocation4 + $0x1], 0  ;;  %s3354_s15 = smov 0   ;;  %s3356_s16 = smov 0  }
   0x7   :  { %s3358_s17 = smov 0   ;;  %s3360_s18 = smov 0  }
   0x8   :  { %s3362_s19 = smov 0   ;;  %s3364_s20 = smov 0  }
   0x9 LB: > { %s2842_s21 = sadd.s32 4294967295, %s3313_s20   ;;  %s2843_s22 = sadd.s32 4294967294, %s3313_s20   ;;  %s3313_s20 = sphi %s3364_s20, %s20_s20   ;;  %s3309_s19 = sphi %s3362_s19, %s3950_s19   ;;  %s3305_s18 = sphi %s3360_s18, %s3949_s18   ;;  %s3301_s17 = sphi %s3358_s17, %s3948_s17   ;;  %s3297_s16 = sphi %s3356_s16, %s3947_s16   ;;  %s3293_s15 = sphi %s3354_s15, %s3946_s15  }
   0xa   : > { %s32_s23 = sadd.s32 1, %s3309_s19  ;;  %s135_s24 = sadd.s32 1, %s3301_s17 }
   0xb   : > { %p34_p0 = scmp.ge.s32.totalorder %s32_s23, 2  ;;  %p145_p1 = scmp.ne.s32.totalorder %s3301_s17, %s3297_s16 }
   0xc   : > { %p146_p2 = scmp.eq.s32.totalorder %s2842_s21, 1  ;;  %p151_p3 = scmp.ne.s32.totalorder %s3297_s16, %s3293_s15 }
   0xd   : > { %s3952_s23 = smov (%p34_p0, %s32_s23), 0  ;;  %p152_p5 = scmp.eq.s32.totalorder %s2843_s22, 1 }
   0xe   : > { %p3394_p4 = por %p146_p2, %p145_p1  ;;  %s130_s26 = ssub.s32 %s3309_s19, %s3952_s23 }
   0xf   : > { %p2844_p6 = scmp.ge.s32.totalorder %s3313_s20, 1  ;;  %p133_p7 = scmp.eq.s32.totalorder %s130_s26, 0 }
  0x10   : > { %s3935_s25 = scalar_select %p3394_p4, 1, 0 }
  0x11   : > { %p3401_p8 = por %p152_p5, %p151_p3  ;;  %p159_p9 = scmp.lt.s32.totalorder %s3313_s20, 3 }
  0x12   : > { %s3407_s28 = scalar_select %p133_p7, %s3301_s17, %s135_s24  }
  0x13   : > { %s3936_s27 = scalar_select %p3401_p8, 1, 0 }
  0x14   : > { %p3409_p10 = pnand %p2844_p6, %p159_p9  ;;  %p3413_p11 = scmp.eq.s32.totalorder %s2842_s21, 0 }
  0x15   : > { %s3315_s5 = smov [#allocation7]   ;;  %s3316_s8 = smov [#allocation6]  }
  0x16   : > { %s3937_s29 = scalar_select %p3409_p10, 1, 0 }
  0x17   : > { %s3938_s30 = scalar_select %p3413_p11, 1, 0 }
  0x18   : > { %p3033_p12 = pneg %p3409_p10  ;;  %s197_s6 = sshll.u32 %s3315_s5, 4  ;;  %s198_s6 = int_to_ptr.vmem [resolvable:$true] %s197_s6 }
  0x19   : > { %s183_s9 = sshll.u32 %s3316_s8, 4  ;;  %s3940_s2 = sld [smem:[#allocation15_spill]]  ;;  %s184_s9 = int_to_ptr.vmem [resolvable:$true] %s183_s9 }
  0x1a   : > { %p3421_p13 = pnand %p3413_p11, %p3033_p12 }
  0x1c   : > { %p3433_p1 = pneg %p3421_p13 }
  0x1f   : > { %s3126_s12 = scalar_lea.hbm %s3940_s2, 512 }
  0x20   : > { %p3127_p0 = scmp.ne.s32.totalorder %s3940_s2, %s3126_s12  ;;  %p3133_p5 = scmp.lt.u32.totalorder %s3126_s12, %s3940_s2 }
  0x22   : > { %p3129_p2 = pnand %p3433_p1, %p3127_p0 }
  0x24   : > { %p3130_p3 = pneg %p3129_p2 }
  0x26   : > { %p3135_p6 = pnand %p3133_p5, %p3130_p3 }
  0x28   : > { %3138 = shalt.err (!%p3135_p6)
}
  0x29   : > { %s3139_s26 = scalar_lea.vmem %s198_s6, 512  ;;  %p3147_p8 = scmp.lt.s32.totalorder %s198_s6, %s198_s6 }
  0x2a   : > { %p3140_p7 = scmp.ne.s32.totalorder %s198_s6, %s3139_s26  ;;  %p3148_p4 = scmp.lt.s32.totalorder %s3139_s26, %s3139_s26 }
  0x2c   : > { %p3142_p9 = pnand %p3140_p7, %p3433_p1  ;;  %p3149_p11 = por %p3148_p4, %p3147_p8 }
  0x2e   : > { %p3143_p12 = pneg %p3142_p9 }
  0x30   : > { %p3150_p10 = pnand %p3149_p11, %p3143_p12 }
  0x32   : > { %3153 = shalt.err (!%p3150_p10)
}
  0x33   : > { %3042 = dma.hbm_to_vmem [thread:$0]  (!%p3421_p13), %s3940_s2, 512, %s198_s6, [#allocation8]  }
  0x34   : > { %s3154_s12 = scalar_lea.hbm %s3925_s0, 16 }
  0x35   : > { %p3155_p0 = scmp.ne.s32.totalorder %s3925_s0, %s3154_s12  ;;  %p3161_p8 = scmp.lt.u32.totalorder %s3154_s12, %s3925_s0 }
  0x37   : > { %p3157_p2 = pnand %p3155_p0, %p3433_p1 }
  0x39   : > { %p3158_p4 = pneg %p3157_p2 }
  0x3b   : > { %p3163_p10 = pnand %p3161_p8, %p3158_p4 }
  0x3d   : > { %3166 = shalt.err (!%p3163_p10)
}
  0x3e   : > { %s3317_s26 = smov [#allocation2]   ;;  %s3318_s8 = smov [#allocation9]  }
  0x3f   : > { %3036 = dma.hbm_to_smem (!%p3421_p13), %s3925_s0, 16, %s3317_s26, [#allocation5]  }
  0x40   : > { %s207_s10 = sshll.u32 %s3318_s8, 4  ;;  %s3167_s14 = scalar_lea.hbm %s3926_s1, 64  ;;  %s208_s10 = int_to_ptr.vmem [resolvable:$true] %s207_s10 }
  0x41   : > { %p3168_p11 = scmp.ne.s32.totalorder %s3926_s1, %s3167_s14  ;;  %p3174_p6 = scmp.lt.u32.totalorder %s3167_s14, %s3926_s1 }
  0x43   : > { %p3170_p3 = pnand %p3168_p11, %p3433_p1 }
  0x45   : > { %p3171_p5 = pneg %p3170_p3 }
  0x47   : > { %p3176_p7 = pnand %p3174_p6, %p3171_p5 }
  0x49   : > { %3179 = shalt.err (!%p3176_p7)
}
  0x4a   : > { %s3180_s26 = scalar_lea.vmem %s184_s9, 64  ;;  %p3188_p2 = scmp.lt.s32.totalorder %s184_s9, %s184_s9 }
  0x4b   : > { %p3181_p9 = scmp.ne.s32.totalorder %s184_s9, %s3180_s26  ;;  %p3189_p4 = scmp.lt.s32.totalorder %s3180_s26, %s3180_s26 }
  0x4d   : > { %p3183_p12 = pnand %p3181_p9, %p3433_p1  ;;  %p3190_p8 = por %p3189_p4, %p3188_p2 }
  0x4f   : > { %p3184_p0 = pneg %p3183_p12 }
  0x51   : > { %p3191_p10 = pnand %p3190_p8, %p3184_p0 }
  0x53   : > { %3194 = shalt.err (!%p3191_p10)
}
  0x54   : > { %3039 = dma.hbm_to_vmem [thread:$0]  (!%p3421_p13), %s3926_s1, 64, %s184_s9, [#allocation3]  }
  0x55   : > { %s3195_s11 = scalar_lea.hbm %s3928_s3, 2048 }
  0x56   : > { %p3196_p11 = scmp.ne.s32.totalorder %s3928_s3, %s3195_s11  ;;  %p3202_p6 = scmp.lt.u32.totalorder %s3195_s11, %s3928_s3 }
  0x58   : > { %p3198_p3 = pnand %p3196_p11, %p3433_p1 }
  0x5a   : > { %p3199_p5 = pneg %p3198_p3 }
  0x5c   : > { %p3204_p7 = pnand %p3202_p6, %p3199_p5 }
  0x5e   : > { %3207 = shalt.err (!%p3204_p7)
}
  0x5f   : > { %s3208_s24 = scalar_lea.vmem %s208_s10, 2048  ;;  %p3216_p2 = scmp.lt.s32.totalorder %s208_s10, %s208_s10 }
  0x60   : > { %p3209_p9 = scmp.ne.s32.totalorder %s208_s10, %s3208_s24  ;;  %p3217_p4 = scmp.lt.s32.totalorder %s3208_s24, %s3208_s24 }
  0x62   : > { %p3211_p12 = pnand %p3209_p9, %p3433_p1  ;;  %p3218_p8 = por %p3217_p4, %p3216_p2 }
  0x64   : > { %p3212_p0 = pneg %p3211_p12 }
  0x66   : > { %p3219_p10 = pnand %p3218_p8, %p3212_p0 }
  0x68   : > { %3222 = shalt.err (!%p3219_p10)
}
  0x69   : > { %s3319_s9 = smov 1024   ;;  %s3320_s26 = smov 64  }
  0x6a   : > { %3045 = dma.hbm_to_vmem [thread:$0]  (!%p3421_p13), %s3928_s3, 2048, %s208_s10, [#allocation8], %s3319_s9, %s3319_s9, %s3320_s26  }
  0x6b   : > { %p3942_p11 = scmp.ne.s32.totalorder %s3937_s29, 0 }
  0x6c   : > { %p3943_p3 = scmp.ne.s32.totalorder (!%p3942_p11), %s3938_s30, 0 }
  0x6d   : > { %223 = sbr.rel (%p3942_p11) target bundleno = 568 (0x238), region = 36 }
  0x74   : > { %3276 = dma.done.wait (%p3943_p3), [#allocation5], 16  }
  0x75   : > { %3278 = vsyncadd (%p3943_p3), [#allocation5], 4294967280 }
  0x76   : > { %3280 = dma.done.wait (%p3943_p3), [#allocation3], 64  }
  0x77   : > { %3282 = vsyncadd (%p3943_p3), [#allocation3], 4294967232 }
  0x78   : > { %3284 = dma.done.wait (%p3943_p3), [#allocation8], 2560  }
  0x79   : > { %3286 = vsyncadd (%p3943_p3), [#allocation8], 4294964736 }
  0x7a   : > { %241 = sfence }
  0x7b   : > { %v510_v0 = vld [vmem:[#allocation9 + $0x8] sm:$0xff]  ;;  %v512_v2 = vld [vmem:[#allocation9 + $0x18] sm:$0xff]  ;;  %v259_v3 = vlaneseq  ;;  %s2855_s29 = sshll.u32 %s3305_s18, 3  ;;  %v509_v8 = vld [vmem:[#allocation9] sm:$0xff]  ;;  %v3321_v10 = vmov 0.0   ;;  %s473_s30 = sld [smem:[#allocation2]] }
  0x7c   : > { %v518_v1 = vld [vmem:[#allocation9 + $0x48] sm:$0xff]  ;;  %v529_v4 = vand.u32 4294901760, %v510_v0  ;;  %v520_v6 = vld [vmem:[#allocation9 + $0x58] sm:$0xff]  ;;  %v1020_v7 = vand.u32 4294901760, %v512_v2  ;;  %v517_v9 = vld [vmem:[#allocation9 + $0x40] sm:$0xff]  ;;  %597 = vmatprep.mubr.f32.mxu0 %v3321_v10  ;;  %1088 = vmatprep.mubr.f32.mxu1 %v3321_v10  ;;  %v262_v11 = vstv %s2855_s29  ;;  %v531_v13 = vand.u32 4294901760, %v509_v8 }
  0x7d   : > { %v533_v5 = vand.u32 4294901760, %v518_v1  ;;  %v1024_v12 = vand.u32 4294901760, %v520_v6  ;;  %v535_v14 = vand.u32 4294901760, %v517_v9  ;;  %v511_v15 = vld [vmem:[#allocation9 + $0x10] sm:$0xff]  ;;  %v3518_v17 = vshrl.u32 %v259_v3, 7  ;;  %s2864_s7 = sld [smem:[#allocation2 + $0x1]] }
  0x7e   : > { %v519_v16 = vld [vmem:[#allocation9 + $0x50] sm:$0xff]  ;;  %v3522_v19 = vsub.f32 %v510_v0, %v529_v4  ;;  %v3526_v21 = vsub.f32 %v512_v2, %v1020_v7  ;;  %v3534_v25 = vsub.f32 %v509_v8, %v531_v13  ;;  %v1022_v27 = vand.u32 4294901760, %v511_v15  ;;  %s2865_s21 = sld [smem:[#allocation2 + $0x2]]  ;;  %s254_s10 = sand.u32 1, %s3297_s16  }
  0x7f   : > { %v3520_v18 = vpack.c.bf16 %v533_v5, %v529_v4  ;;  %v3524_v20 = vsub.f32 %v518_v1, %v533_v5  ;;  %v3528_v22 = vpack.c.bf16 %v1024_v12, %v1020_v7  ;;  %v3530_v23 = vsub.f32 %v520_v6, %v1024_v12  ;;  %s2854_s5 = sshll.u32 %s254_s10, 6  ;;  %s2874_s11 = sshll.u32 %s3305_s18, 10 }
  0x80   : > { %v3532_v24 = vpack.c.bf16 %v535_v14, %v531_v13  ;;  %v3537_v26 = vsub.f32 %v517_v9, %v535_v14  ;;  %v1026_v28 = vand.u32 4294901760, %v519_v16  ;;  %v611_v29 = vand.u32 4294901760, %v3522_v19  ;;  %s3833_s8 = scalar_lea.vmem [#allocation10], %s2854_s5  ;;  %s3872_s12 = scalar_lea.hbm %s3929_s4, %s2874_s11 }
  0x81   : > { %2876 = vmatprep.subr.bf16.mxu0 %v3520_v18  ;;  %2900 = vmatprep.subr.bf16.mxu1 %v3528_v22  ;;  %v623_v30 = vand.u32 4294901760, %v3524_v20  ;;  %v1102_v31 = vand.u32 4294901760, %v3526_v21  ;;  %v1114_v32 = vand.u32 4294901760, %v3530_v23  ;;  %v263_v33 = vadd.s32 %v262_v11, %v3518_v17  ;;  %s2737_s13 = sshll.u32 %s3833_s8, 4  ;;  %s2721_s18 = scalar_lea.sflag [#allocation4], %s254_s10  ;;  %s3874_s13 = int_to_ptr.vmem [resolvable:$true] %s2737_s13 }
  0x82   : > { %2878 = vmatpush1.bf16.msra.mxu0 %v3532_v24  ;;  %v3546_v34 = vpack.c.bf16 %v1026_v28, %v1022_v27  ;;  %v3548_v35 = vsub.f32 %v511_v15, %v1022_v27  ;;  %v3550_v36 = vsub.f32 %v519_v16, %v1026_v28  ;;  %v612_v37 = vsub.f32 %v3522_v19, %v611_v29  ;;  %s3223_s24 = scalar_lea.vmem %s3874_s13, 1024  ;;  %p3944_p1 = scmp.ne.s32.totalorder %s3935_s25, 0 }
  0x83   : > { %v624_v38 = vsub.f32 %v3524_v20, %v623_v30  ;;  %v1103_v39 = vsub.f32 %v3526_v21, %v1102_v31  ;;  %v1115_v40 = vsub.f32 %v3530_v23, %v1114_v32  ;;  %v264_v41 = vcvt.s32.f32 %v263_v33  ;;  %p3224_p13 = scmp.ne.s32.totalorder %s3874_s13, %s3223_s24  ;;  %s3328_s9 = smov [#allocation10]  }
  0x84   : > { %2902 = vmatpush1.bf16.msra.mxu1 %v3546_v34  ;;  %v613_v42 = vand.u32 4294901760, %v612_v37  ;;  %v617_v51 = vand.u32 4294901760, %v3534_v25  ;;  %v629_v52 = vand.u32 4294901760, %v3537_v26  ;;  %v1108_v54 = vand.u32 4294901760, %v3548_v35  ;;  %s3227_s26 = sshll.u32 %s3328_s9, 4  ;;  %s3228_s26 = int_to_ptr.vmem [resolvable:$false] %s3227_s26 }
  0x85   : > { %v625_v43 = vand.u32 4294901760, %v624_v38  ;;  %v1104_v44 = vand.u32 4294901760, %v1103_v39  ;;  %v1116_v45 = vand.u32 4294901760, %v1115_v40  ;;  %v3557_v46 = vmul.f32 0.20943952, %v264_v41  ;;  %p3225_p5 = pnand %p3224_p13, %p3944_p1  ;;  %s3229_s2 = scalar_lea.vmem %s3228_s26, 2048 }
  0x86   : > { %v1120_v55 = vand.u32 4294901760, %v3550_v36  ;;  %v2883_v56 = vpack.c.bf16 %v3524_v20, %v3522_v19  ;;  %v618_v57 = vsub.f32 %v3534_v25, %v617_v51  ;;  %v630_v58 = vsub.f32 %v3537_v26, %v629_v52  ;;  %v514_v19 = vld [vmem:[#allocation9 + $0x28] sm:$0xff]  ;;  %p3230_p7 = scmp.lt.s32.totalorder %s3874_s13, %s3228_s26  ;;  %p3231_p9 = scmp.lt.s32.totalorder %s3229_s2, %s3223_s24 }
  0x87   : > { %v2879_v47 = vpack.c.bf16 %v625_v43, %v613_v42  ;;  %v2903_v48 = vpack.c.bf16 %v1116_v45, %v1104_v44  ;;  %v269_v49 = vand.u32 2139095040, %v3557_v46  ;;  %v266_v50 = vand.u32 2147483647, %v3557_v46  ;;  %v522_v20 = vld [vmem:[#allocation9 + $0x68] sm:$0xff]  ;;  %p3226_p6 = pneg %p3225_p5 }
  0x88   : > { %v2907_v59 = vpack.c.bf16 %v3530_v23, %v3526_v21  ;;  %v1109_v61 = vsub.f32 %v3548_v35, %v1108_v54  ;;  %v1121_v62 = vsub.f32 %v3550_v36, %v1120_v55  ;;  %v2885_v63 = vpack.c.bf16 %v3537_v26, %v3534_v25  ;;  %v516_v21 = vld [vmem:[#allocation9 + $0x38] sm:$0xff]  ;;  %v3664_v25 = vld [vmem:[#allocation9 + $0x20] sm:$0xff]  ;;  %p3232_p12 = por %p3231_p9, %p3230_p7 }
  0x89   : > { %2880 = vmatprep.subr.bf16.mxu0 %v2879_v47  ;;  %2904 = vmatprep.subr.bf16.mxu1 %v2903_v48  ;;  %v270_v53 = vshrl.u32 %v269_v49, 23  ;;  %v273_v0 = vand.u32 8388607, %v266_v50  ;;  %v619_v1 = vand.u32 4294901760, %v618_v57  ;;  %v631_v2 = vand.u32 4294901760, %v630_v58  ;;  %v524_v23 = vld [vmem:[#allocation9 + $0x78] sm:$0xff] }
  0x8a   : > { %v2909_v3 = vpack.c.bf16 %v3550_v36, %v3548_v35  ;;  %v1110_v5 = vand.u32 4294901760, %v1109_v61  ;;  %v1122_v6 = vand.u32 4294901760, %v1121_v62  ;;  %v3583_v14 = vpack.c.bf16 %v623_v30, %v611_v29  ;;  %v521_v36 = vld [vmem:[#allocation9 + $0x60] sm:$0xff]  ;;  %p3233_p0 = pnand %p3232_p12, %p3226_p6 }
  0x8b   : > { %v2856_v60 = vadd.s32 4294967169, %v270_v53  ;;  %v3579_v7 = vpack.c.bf16 %v631_v2, %v619_v1  ;;  %v274_v9 = vor.u32 8388608, %v273_v0  ;;  %v3585_v15 = vpack.c.bf16 %v1114_v32, %v1102_v31 }
  0x8c   : > { %v3581_v8 = vpack.c.bf16 %v1122_v6, %v1110_v5  ;;  %v3322_v27 = vmov 683565275   ;;  %v3323_v33 = vmov 2475754826   ;;  %v3324_v38 = vmov 2131351028  }
  0x8d   : > { %v276_v4 = vadd.s32 1, %v2856_v60  ;;  %v3325_v40 = vmov 2102212464   ;;  %v3326_v42 = vmov 920167782   ;;  %v314_v44 = vshll.u32 %v274_v9, 8 }
  0x8e   : > { %v3327_v31 = vmov 1326507024   ;;  %v3587_v58 = vpack.c.bf16 %v629_v52, %v617_v51  ;;  %v3589_v62 = vpack.c.bf16 %v1120_v55, %v1108_v54  ;;  %vm268_vm7 = vcmp.lt.s32.totalorder %v3557_v46, 0 }
  0x8f   : > { %vm277_vm0 = vcmp.gt.s32.totalorder %v276_v4, 0  ;;  %vm267_vm8 = vcmp.le.f32.partialorder %v266_v50, 0.7853982  ;;  %vm358_vm15 = vweird.f32 %v3557_v46  ;;  %v1511_v26 = vand.u32 4294901760, %v514_v19 }
  0x90   : > { %v278_v11 = vsel %vm277_vm0, %v276_v4, 0  ;;  %vm525_vm0 = vcmask 130048   ;;  %v1515_v35 = vand.u32 4294901760, %v522_v20 }
  0x91   : > { %v279_v12 = vshrl.u32 %v278_v11, 5  ;;  %v280_v13 = vand.u32 31, %v278_v11 }
  0x93   : > { %v281_v16 = vsub.s32 32, %v280_v13  ;;  %v283_v28 = vshll.u32 %v3322_v27, %v280_v13  ;;  %v286_v37 = vshll.u32 %v3323_v33, %v280_v13  ;;  %v289_v39 = vshll.u32 %v3324_v38, %v280_v13 }
  0x94   : > { %v292_v41 = vshll.u32 %v3325_v40, %v280_v13  ;;  %v295_v43 = vshll.u32 %v3326_v42, %v280_v13  ;;  %vm298_vm1 = vcmp.lt.s32.totalorder %v279_v12, 1  ;;  %vm299_vm2 = vcmp.lt.s32.totalorder %v279_v12, 2 }
  0x95   : > { %v282_v45 = vshrl.u32 %v3322_v27, %v281_v16  ;;  %v284_v47 = vshrl.u32 %v3323_v33, %v281_v16  ;;  %v287_v48 = vshrl.u32 %v3324_v38, %v281_v16  ;;  %v290_v29 = vshrl.u32 %v3325_v40, %v281_v16 }
  0x96   : > { %v293_v30 = vshrl.u32 %v3326_v42, %v281_v16  ;;  %v296_v32 = vshrl.u32 %v3327_v31, %v281_v16  ;;  %vm301_vm3 = vcmp.lt.s32.totalorder %v279_v12, 4  ;;  %vm300_vm4 = vcmp.lt.s32.totalorder %v279_v12, 3 }
  0x97   : > { %v285_v49 = vor.u32 %v284_v47, %v283_v28  ;;  %v288_v53 = vor.u32 %v287_v48, %v286_v37  ;;  %v291_v57 = vor.u32 %v290_v29, %v289_v39 }
  0x98   : > { %v294_v60 = vor.u32 %v293_v30, %v292_v41  ;;  %v297_v61 = vor.u32 %v296_v32, %v295_v43 }
  0x99   : > { %v302_v0 = vsel %vm298_vm1, %v282_v45, %v285_v49  ;;  %v303_v1 = vsel %vm301_vm3, %v291_v57, 2102212464  ;;  %v306_v2 = vsel %vm298_vm1, %v285_v49, %v288_v53  ;;  %v310_v4 = vsel %vm298_vm1, %v288_v53, %v291_v57 }
  0x9a   : > { %v304_v5 = vsel %vm300_vm4, %v288_v53, %v303_v1  ;;  %v307_v6 = vsel %vm301_vm3, %v294_v60, 920167782  ;;  %v311_v9 = vsel %vm301_vm3, %v297_v61, 1326507024 }
  0x9b   : > { %v308_v11 = vsel %vm300_vm4, %v291_v57, %v307_v6  ;;  %v312_v13 = vsel %vm300_vm4, %v294_v60, %v311_v9  ;;  %v305_v51 = vsel %vm299_vm2, %v302_v0, %v304_v5 }
  0x9c   : > { %v309_v52 = vsel %vm299_vm2, %v306_v2, %v308_v11  ;;  %v313_v16 = vsel %vm299_vm2, %v310_v4, %v312_v13  ;;  %v321_v33 = vmul.u32 %v314_v44, %v305_v51 }
  0x9d   : > { %v3597_v54 = vmul.u32.u64.low %v314_v44, %v313_v16  ;;  %v3598_v55 = vmul.u32.u64.high %v314_v44, %v313_v16, %v3597_v54  ;;  %v3600_v27 = vmul.u32.u64.low %v314_v44, %v309_v52  ;;  %v3601_v28 = vmul.u32.u64.high %v314_v44, %v309_v52, %v3600_v27 }
  0x9f   : > { %vm323_vm5 = vc.u32 %v3598_v55, %v3600_v27  ;;  %v324_v37 = vadd.s32 1, %v3601_v28  ;;  %v322_v29 = vadd.s32 %v3600_v27, %v3598_v55 }
  0xa1   : > { %v325_v38 = vsel %vm323_vm5, %v324_v37, %v3601_v28 }
  0xa2   : > { %v326_v39 = vadd.s32 %v325_v38, %v321_v33 }
  0xa4   : > { %v327_v40 = vadd.s32 536870912, %v326_v39 }
  0xa6   : > { %v328_v41 = vshrl.u32 %v327_v40, 30 }
  0xa8   : > { %v329_v42 = vshll.u32 %v328_v41, 30  ;;  %v352_v2 = vsub.s32 4, %v328_v41 }
  0xaa   : > { %v330_v43 = vsub.s32 %v326_v39, %v329_v42  ;;  %v353_v6 = vsel %vm268_vm7, %v352_v2, %v328_v41 }
  0xab   : > { %v355_v13 = vsel %vm267_vm8, 0, %v353_v6 }
  0xac   : > { %v332_v12 = vsub.s32 0, %v330_v43  ;;  %v462_v51 = vadd.s32 3, %v355_v13  ;;  %v359_v52 = vand.u32 3, %v355_v13 }
  0xae   : > { %v2857_v45 = vmin.u32 %v332_v12, %v330_v43  ;;  %v463_v16 = vand.u32 3, %v462_v51  ;;  %vm364_vm9 = vcmp.eq.s32.totalorder %v359_v52, 2  ;;  %vm361_vm11 = vcmp.eq.s32.totalorder %v359_v52, 0 }
  0xaf   : > { %vm360_vm13 = vcmp.lt.s32.totalorder %v359_v52, 2 }
  0xb0   : > { %v334_v47 = vclz %v2857_v45  ;;  %vm468_vm10 = vcmp.eq.s32.totalorder %v463_v16, 2  ;;  %vm465_vm12 = vcmp.eq.s32.totalorder %v463_v16, 0  ;;  %vm464_vm14 = vcmp.lt.s32.totalorder %v463_v16, 2 }
  0xb2   : > { %v2858_v48 = vadd.s32 4294967294, %v334_v47 }
  0xb4   : > { %vm2859_vm6 = vcmp.lt.s32.totalorder %v2858_v48, 0 }
  0xb5   : > { %v337_v30 = vsel %vm2859_vm6, 0, %v2858_v48  ;;  %v485_v48 = vstv %s2865_s21 }
  0xb6   : > { %v338_v44 = vsub.s32 32, %v337_v30  ;;  %v339_v31 = vshll.u32 %v330_v43, %v337_v30  ;;  %v342_v32 = vsub.s32 4294967266, %v337_v30  ;;  %v477_v43 = vstv %s473_s30 }
  0xb8   : > { %v340_v49 = vshrl.u32 %v322_v29, %v338_v44  ;;  %v343_v53 = vadd.s32 127, %v342_v32  ;;  %v2866_v44 = vld [vmem:[#allocation6] ss:$0 sm:$0xff] }
  0xba   : > { %v341_v57 = vor.u32 %v340_v49, %v339_v31  ;;  %v344_v60 = vshll.u32 %v343_v53, 23  ;;  %v2867_v49 = vld [vmem:[#allocation6 + $0x1] ss:$0 sm:$0xff] }
  0xbc   : > { %v345_v61 = vor.u32 4788187, %v344_v60  ;;  %v348_v0 = vcvt.s32.f32 %v341_v57 }
  0xbe   : > { %v346_v1 = vand.u32 2147483647, %v345_v61 }
  0xc0   : > { %v349_v4 = vmul.f32 %v348_v0, %v346_v1  ;;  %v2868_v1 = vld [vmem:[#allocation6 + $0x2] ss:$0 sm:$0xff] }
  0xc2   : > { %v350_v5 = vxor.u32 2147483648, %v349_v4 }
  0xc4   : > { %v351_v9 = vsel %vm268_vm7, %v350_v5, %v349_v4 }
  0xc5   : > { %v354_v11 = vsel %vm267_vm8, %v3557_v46, %v351_v9  ;;  %v481_v46 = vstv %s2864_s7 }
  0xc6   : > { %3120 = vcosq.f32 %v354_v11 }
  0xc7   : > { %3122 = vsinq.f32 %v354_v11 }
  0xd0   : > { %v3121_v54 = vpop.eup %3120 }
  0xd1   : > { %v3123_v55 = vpop.eup %3122  ;;  %v365_v50 = vxor.u32 2147483648, %v3121_v54 }
  0xd2   : > { %v362_v27 = vxor.u32 2147483648, %v3123_v55 }
  0xd3   : > { %v366_v28 = vsel %vm364_vm9, %v365_v50, %v3123_v55  ;;  %v470_v33 = vsel %vm468_vm10, %v365_v50, %v3123_v55  ;;  %v3671_v55 = vsub.f32 %v514_v19, %v1511_v26  ;;  %v3673_v50 = vsub.f32 %v522_v20, %v1515_v35 }
  0xd4   : > { %v363_v37 = vsel %vm361_vm11, %v3121_v54, %v362_v27  ;;  %v467_v38 = vsel %vm465_vm12, %v3121_v54, %v362_v27 }
  0xd5   : > { %v367_v39 = vsel %vm360_vm13, %v363_v37, %v366_v28  ;;  %v471_v40 = vsel %vm464_vm14, %v467_v38, %v470_v33  ;;  %v1593_v38 = vand.u32 4294901760, %v3671_v55  ;;  %v2931_v19 = vpack.c.bf16 %v3673_v50, %v3671_v55 }
  0xd6   : > { %v3612_v41 = vsel %vm358_vm15, nan, %v367_v39  ;;  %v3614_v42 = vsel %vm358_vm15, nan, %v471_v40  ;;  %v1605_v39 = vand.u32 4294901760, %v3673_v50 }
  0xd7   : > { %v476_v12 = vmul.f32 %v3612_v41, %v3612_v41  ;;  %v479_v45 = vmul.f32 2.0, %v3612_v41  ;;  %v484_v47 = vmul.f32 %v3614_v42, %v3614_v42  ;;  %v495_v57 = vmul.f32 %v2866_v44, %v3612_v41 }
  0xd8   : > { %v501_v61 = vmul.f32 %v2867_v49, %v3614_v42 }
  0xd9   : > { %v478_v29 = vmul.f32 %v477_v43, %v476_v12  ;;  %v480_v30 = vmul.f32 %v479_v45, %v3614_v42  ;;  %v486_v32 = vmul.f32 %v485_v48, %v484_v47  ;;  %v1594_v45 = vsub.f32 %v3671_v55, %v1593_v38 }
  0xda   : > { %v3710_v47 = vpack.c.bf16 %v1515_v35, %v1511_v26 }
  0xdb   : > { %v482_v31 = vmul.f32 %v481_v46, %v480_v30  ;;  %v1595_v49 = vand.u32 4294901760, %v1594_v45 }
  0xdd   : > { %v483_v53 = vadd.f32 %v482_v31, %v478_v29 }
  0xdf   : > { %v487_v60 = vadd.f32 %v486_v32, %v483_v53 }
  0xe1   : > { %v496_v0 = vadd.f32 %v495_v57, %v487_v60 }
  0xe3   : > { %v502_v2 = vadd.f32 %v501_v61, %v496_v0 }
  0xe5   : > { %v507_v4 = vadd.f32 %v2868_v1, %v502_v2 }
  0xe7   : > { %3124 = vrsqrt.f32 %v507_v4 }
  0xf1   : > { %v3125_v5 = vpop.eup %3124 }
  0xf2   : > { %v527_v6 = vsel %vm525_vm0, %v3125_v5, 0 }
  0xf3   : > { %v3624_v9 = vand.u32 4294901760, %v527_v6 }
  0xf5   : > { %v3627_v11 = vsub.f32 %v527_v6, %v3624_v9 }
  0xf7   : > { %v3630_v13 = vand.u32 4294901760, %v3627_v11 }
  0xf9   : > { %v601_v51 = vsub.f32 %v3627_v11, %v3630_v13 }
  0xfb   : > { %v3634_v52 = vand.u32 4294901760, %v601_v51 }
  0xfd   : > { %603 = vmatmul.mubr.f32.vlgmr.msra.gmra.mrb[0].mxu0 %v3634_v52  ;;  %1094 = vmatmul.mubr.f32.vlgmr.msra.gmra.mrb[0].mxu1 %v3634_v52 }
  0xfe   : > { %2882 = vmatpush1.bf16.msra.mxu0 %v3579_v7  ;;  %2906 = vmatpush1.bf16.msra.mxu1 %v3581_v8  ;;  %v1513_v7 = vand.u32 4294901760, %v3664_v25  ;;  %v1517_v8 = vand.u32 4294901760, %v521_v36 }
  0xff   : > { %693 = vmatprep.mubr.f32.mxu0 %v3321_v10  ;;  %2884 = vmatprep.subr.bf16.mxu0 %v2883_v56  ;;  %v515_v56 = vld [vmem:[#allocation9 + $0x30] sm:$0xff] }
 0x100   : > { %1184 = vmatprep.mubr.f32.mxu1 %v3321_v10  ;;  %2908 = vmatprep.subr.bf16.mxu1 %v2907_v59  ;;  %v523_v59 = vld [vmem:[#allocation9 + $0x70] sm:$0xff]  ;;  %v2004_v16 = vand.u32 4294901760, %v515_v56  ;;  %v3686_v28 = vsub.f32 %v521_v36, %v1517_v8  ;;  %v2925_v57 = vpack.c.bf16 %v1517_v8, %v1513_v7 }
 0x101   : > { %v2008_v54 = vand.u32 4294901760, %v523_v59  ;;  %v3796_v36 = vld [vmem:[#allocation7] ss:$4 sm:$0xff] }
 0x102   : > { %v3688_v33 = vsub.f32 %v515_v56, %v2004_v16  ;;  %v1611_v43 = vand.u32 4294901760, %v3686_v28  ;;  %v3798_v56 = vld [vmem:[#allocation7 + $0x1] ss:$4 sm:$0xff] }
 0x103   : > { %v3690_v37 = vsub.f32 %v523_v59, %v2008_v54  ;;  %v2949_v60 = vpack.c.bf16 %v2008_v54, %v2004_v16  ;;  %v2507_v59 = vsub.s32 1, %v3518_v17 }
 0x104   : > { %v2090_v12 = vand.u32 4294901760, %v3688_v33  ;;  %v1612_v44 = vsub.f32 %v3686_v28, %v1611_v43 }
 0x105   : > { %695 = vmatmul.mubr.f32.vlgmr.msra.gmra.mrb[0].mxu0 %v3624_v9  ;;  %1186 = vmatmul.mubr.f32.vlgmr.msra.gmra.mrb[0].mxu1 %v3624_v9  ;;  %v2508_v8 = vrot.slane %v3796_v36, %v2507_v59  ;;  %v2557_v16 = vrot.slane %v3798_v56, %v2507_v59 }
 0x106   : > { %2886 = vmatpush1.bf16.msra.mxu0 %v2885_v63  ;;  %2910 = vmatpush1.bf16.msra.mxu1 %v2909_v3  ;;  %v2002_v63 = vand.u32 4294901760, %v516_v21  ;;  %v2006_v3 = vand.u32 4294901760, %v524_v23  ;;  %v2091_v31 = vsub.f32 %v3688_v33, %v2090_v12  ;;  %v1613_v0 = vand.u32 4294901760, %v1612_v44 }
 0x107   : > { %773 = vmatprep.mubr.f32.mxu0 %v3321_v10  ;;  %2888 = vmatprep.subr.bf16.mxu0 %v3520_v18 }
 0x108   : > { %1264 = vmatprep.mubr.f32.mxu1 %v3321_v10  ;;  %2912 = vmatprep.subr.bf16.mxu1 %v3528_v22  ;;  %v3677_v27 = vsub.f32 %v524_v23, %v2006_v3  ;;  %v3712_v46 = vpack.c.bf16 %v2006_v3, %v2002_v63  ;;  %v2092_v1 = vand.u32 4294901760, %v2091_v31  ;;  %v2957_v23 = vpack.c.bf16 %v3690_v37, %v3688_v33 }
 0x109   : > { %v2542_v33 = vmul.f32 %v2508_v8, %v3612_v41 }
 0x10d   : > { %776 = vmatmul.mubr.f32.vlgmr.msra.gmra.mrb[0].mxu0 %v3627_v11  ;;  %1267 = vmatmul.mubr.f32.vlgmr.msra.gmra.mrb[0].mxu1 %v3627_v11 }
 0x10e   : > { %2890 = vmatpush1.bf16.msra.mxu0 %v3532_v24  ;;  %2914 = vmatpush1.bf16.msra.mxu1 %v3546_v34 }
 0x10f   : > { %850 = vmatprep.mubr.f32.mxu0 %v3321_v10  ;;  %2892 = vmatprep.subr.bf16.mxu0 %v3583_v14  ;;  %v3675_v14 = vsub.f32 %v516_v21, %v2002_v63  ;;  %v2515_v63 = vsub.s32 3, %v3518_v17 }
 0x110   : > { %1341 = vmatprep.mubr.f32.mxu1 %v3321_v10  ;;  %2916 = vmatprep.subr.bf16.mxu1 %v3585_v15  ;;  %v3682_v15 = vsub.f32 %v3664_v25, %v1513_v7 }
 0x111   : > { %v2955_v20 = vpack.c.bf16 %v3677_v27, %v3675_v14  ;;  %v2516_v54 = vrot.slane %v3796_v36, %v2515_v63  ;;  %v2565_v55 = vrot.slane %v3798_v56, %v2515_v63 }
 0x112   : > { %v1599_v40 = vand.u32 4294901760, %v3682_v15  ;;  %v2933_v21 = vpack.c.bf16 %v3686_v28, %v3682_v15  ;;  %v3814_v28 = vld [vmem:[#allocation7 + $0x2] ss:$4 sm:$0xff] }
 0x114   : > { %v1600_v30 = vsub.f32 %v3682_v15, %v1599_v40  ;;  %v2941_v26 = vpack.c.bf16 %v1611_v43, %v1599_v40 }
 0x115   : > { %854 = vmatmul.mubr.f32.vlgmr.msra.gmra.mrb[0].mxu0 %v3630_v13  ;;  %1345 = vmatmul.mubr.f32.vlgmr.msra.gmra.mrb[0].mxu1 %v3630_v13 }
 0x116   : > { %2894 = vmatpush1.bf16.msra.mxu0 %v3587_v58  ;;  %2918 = vmatpush1.bf16.msra.mxu1 %v3589_v62  ;;  %v2084_v58 = vand.u32 4294901760, %v3675_v14  ;;  %v2096_v62 = vand.u32 4294901760, %v3677_v27  ;;  %v1601_v61 = vand.u32 4294901760, %v1600_v30 }
 0x117   : > { %936 = vmatprep.mubr.f32.mxu0 %v3321_v10  ;;  %2896 = vmatprep.subr.bf16.mxu0 %v3520_v18  ;;  %v2102_v18 = vand.u32 4294901760, %v3690_v37 }
 0x118   : > { %1427 = vmatprep.mubr.f32.mxu1 %v3321_v10  ;;  %2920 = vmatprep.subr.bf16.mxu1 %v3528_v22  ;;  %v1606_v22 = vsub.f32 %v3673_v50, %v1605_v39  ;;  %v2085_v48 = vsub.f32 %v3675_v14, %v2084_v58  ;;  %v2097_v29 = vsub.f32 %v3677_v27, %v2096_v62 }
 0x119   : > { %v2103_v32 = vsub.f32 %v3690_v37, %v2102_v18  ;;  %v2929_v6 = vpack.c.bf16 %v1613_v0, %v1601_v61  ;;  %v2963_v25 = vpack.c.bf16 %v2096_v62, %v2084_v58  ;;  %v2965_v35 = vpack.c.bf16 %v2102_v18, %v2090_v12 }
 0x11a   : > { %v2098_v53 = vand.u32 4294901760, %v2097_v29  ;;  %v2591_v37 = vmul.f32 %v2557_v16, %v3614_v42  ;;  %v2614_v18 = vrot.slane %v3814_v28, %v2507_v59 }
 0x11b   : > { %v2104_v2 = vand.u32 4294901760, %v2103_v32 }
 0x11c   : > { %v2599_v12 = vadd.f32 %v2591_v37, %v2542_v33 }
 0x11d   : > { %938 = vmatmul.mubr.f32.vlgmr.msra.gmra.mrb[0].mxu0 %v3624_v9  ;;  %1429 = vmatmul.mubr.f32.vlgmr.msra.gmra.mrb[0].mxu1 %v3624_v9  ;;  %v2953_v51 = vpack.c.bf16 %v2104_v2, %v2092_v1 }
 0x11e   : > { %2898 = vmatpush1.bf16.msra.mxu0 %v3532_v24  ;;  %2922 = vmatpush1.bf16.msra.mxu1 %v3546_v34  ;;  %v1607_v24 = vand.u32 4294901760, %v1606_v22  ;;  %v2086_v34 = vand.u32 4294901760, %v2085_v48  ;;  %v2622_v22 = vrot.slane %v3814_v28, %v2515_v63  ;;  %v2648_v29 = vadd.f32 %v2614_v18, %v2599_v12 }
 0x11f   : > { %1012 = vmatprep.mubr.f32.mxu0 %v3321_v10  ;;  %1503 = vmatprep.mubr.f32.mxu1 %v3321_v10 }
 0x120   : > { %2924 = vmatprep.subr.bf16.mxu0 %v3710_v47  ;;  %2948 = vmatprep.subr.bf16.mxu1 %v3712_v46  ;;  %v2927_v4 = vpack.c.bf16 %v1607_v24, %v1595_v49  ;;  %v2951_v5 = vpack.c.bf16 %v2098_v53, %v2086_v34 }
 0x125   : > { %1014 = vmatmul.mubr.f32.vlgmr.msra.gmra.mrb[0].mxu0 %v3624_v9  ;;  %1505 = vmatmul.mubr.f32.vlgmr.msra.gmra.mrb[0].mxu1 %v3624_v9 }
 0x126   : > { %2926 = vmatpush1.bf16.msra.mxu0 %v2925_v57  ;;  %2950 = vmatpush1.bf16.msra.mxu1 %v2949_v60 }
 0x127   : > { %1579 = vmatprep.mubr.f32.mxu0 %v3321_v10  ;;  %2928 = vmatprep.subr.bf16.mxu0 %v2927_v4 }
 0x128   : > { %2070 = vmatprep.mubr.f32.mxu1 %v3321_v10  ;;  %2952 = vmatprep.subr.bf16.mxu1 %v2951_v5 }
 0x129   : > { %1585 = vmatmul.mubr.f32.vlgmr.msra.gmra.mrb[2].mxu0 %v3634_v52  ;;  %2076 = vmatmul.mubr.f32.vlgmr.msra.gmra.mrb[2].mxu1 %v3634_v52  ;;  %v2939_v52 = vpack.c.bf16 %v1605_v39, %v1593_v38  ;;  %v2544_v38 = vmul.f32 %v2516_v54, %v3612_v41  ;;  %v2593_v39 = vmul.f32 %v2565_v55, %v3614_v42 }
 0x12a   : > { %2930 = vmatpush1.bf16.msra.mxu0 %v2929_v6  ;;  %2954 = vmatpush1.bf16.msra.mxu1 %v2953_v51  ;;  %v2519_v51 = vsub.s32 4, %v3518_v17 }
 0x12b   : > { %1675 = vmatprep.mubr.f32.mxu0 %v3321_v10  ;;  %2932 = vmatprep.subr.bf16.mxu0 %v2931_v19  ;;  %v2601_v45 = vadd.f32 %v2593_v39, %v2544_v38  ;;  %v2527_v19 = vsub.s32 6, %v3518_v17 }
 0x12c   : > { %2166 = vmatprep.mubr.f32.mxu1 %v3321_v10  ;;  %2956 = vmatprep.subr.bf16.mxu1 %v2955_v20  ;;  %v2523_v20 = vsub.s32 5, %v3518_v17 }
 0x12d   : > { %v2650_v30 = vadd.f32 %v2622_v22, %v2601_v45  ;;  %v2634_v55 = vrot.slane %v3814_v28, %v2527_v19 }
 0x131   : > { %1677 = vmatmul.mubr.f32.vlgmr.msra.gmra.mrb[2].mxu0 %v3624_v9  ;;  %2168 = vmatmul.mubr.f32.vlgmr.msra.gmra.mrb[2].mxu1 %v3624_v9 }
 0x132   : > { %2934 = vmatpush1.bf16.msra.mxu0 %v2933_v21  ;;  %2958 = vmatpush1.bf16.msra.mxu1 %v2957_v23  ;;  %v2531_v21 = vsub.s32 7, %v3518_v17  ;;  %v2520_v23 = vrot.slane %v3796_v36, %v2519_v51 }
 0x133   : > { %1755 = vmatprep.mubr.f32.mxu0 %v3321_v10  ;;  %2936 = vmatprep.subr.bf16.mxu0 %v3710_v47 }
 0x134   : > { %2246 = vmatprep.mubr.f32.mxu1 %v3321_v10  ;;  %2960 = vmatprep.subr.bf16.mxu1 %v3712_v46 }
 0x139   : > { %1758 = vmatmul.mubr.f32.vlgmr.msra.gmra.mrb[2].mxu0 %v3627_v11  ;;  %2249 = vmatmul.mubr.f32.vlgmr.msra.gmra.mrb[2].mxu1 %v3627_v11  ;;  %v2503_v11 = vsub.s32 0, %v3518_v17 }
 0x13a   : > { %2938 = vmatpush1.bf16.msra.mxu0 %v2925_v57  ;;  %2962 = vmatpush1.bf16.msra.mxu1 %v2949_v60 }
 0x13b   : > { %1832 = vmatprep.mubr.f32.mxu0 %v3321_v10  ;;  %2940 = vmatprep.subr.bf16.mxu0 %v2939_v52  ;;  %v2504_v3 = vrot.slane %v3796_v36, %v2503_v11  ;;  %v2610_v62 = vrot.slane %v3814_v28, %v2503_v11  ;;  %v2569_v52 = vrot.slane %v3798_v56, %v2519_v51 }
 0x13c   : > { %2323 = vmatprep.mubr.f32.mxu1 %v3321_v10  ;;  %2964 = vmatprep.subr.bf16.mxu1 %v2963_v25  ;;  %v2528_v25 = vrot.slane %v3796_v36, %v2527_v19 }
 0x13d   : > { %v2541_v50 = vmul.f32 %v2504_v3, %v3612_v41 }
 0x13e   : > { %v2547_v3 = vmul.f32 %v2528_v25, %v3612_v41 }
 0x141   : > { %1836 = vmatmul.mubr.f32.vlgmr.msra.gmra.mrb[2].mxu0 %v3630_v13  ;;  %2327 = vmatmul.mubr.f32.vlgmr.msra.gmra.mrb[2].mxu1 %v3630_v13  ;;  %v2511_v13 = vsub.s32 2, %v3518_v17  ;;  %v2594_v17 = vmul.f32 %v2569_v52, %v3614_v42 }
 0x142   : > { %2942 = vmatpush1.bf16.msra.mxu0 %v2941_v26  ;;  %2966 = vmatpush1.bf16.msra.mxu1 %v2965_v35  ;;  %v2577_v26 = vrot.slane %v3798_v56, %v2527_v19  ;;  %v2524_v35 = vrot.slane %v3796_v36, %v2523_v20 }
 0x143   : > { %1918 = vmatprep.mubr.f32.mxu0 %v3321_v10  ;;  %2944 = vmatprep.subr.bf16.mxu0 %v3710_v47  ;;  %v2512_v7 = vrot.slane %v3796_v36, %v2511_v13  ;;  %v2618_v43 = vrot.slane %v3814_v28, %v2511_v13  ;;  %v3825_v47 = vld [vmem:[#allocation7 + $0x3] ss:$4 sm:$0xff] }
 0x144   : > { %2409 = vmatprep.mubr.f32.mxu1 %v3321_v10  ;;  %2968 = vmatprep.subr.bf16.mxu1 %v3712_v46  ;;  %v2667_v44 = vrot.slane %v3825_v47, %v2503_v11  ;;  %v2675_v31 = vrot.slane %v3825_v47, %v2511_v13  ;;  %v2671_v24 = vrot.slane %v3825_v47, %v2507_v59 }
 0x145   : > { %v2543_v27 = vmul.f32 %v2512_v7, %v3612_v41  ;;  %v2679_v34 = vrot.slane %v3825_v47, %v2515_v63  ;;  %v2581_v59 = vrot.slane %v3798_v56, %v2531_v21  ;;  %v2545_v63 = vmul.f32 %v2520_v23, %v3612_v41 }
 0x146   : > { %v2546_v7 = vmul.f32 %v2524_v35, %v3612_v41  ;;  %v2691_v39 = vrot.slane %v3825_v47, %v2527_v19 }
 0x147   : > { %v2597_v16 = vmul.f32 %v2581_v59, %v3614_v42  ;;  %v2602_v54 = vadd.f32 %v2594_v17, %v2545_v63 }
 0x149   : > { %1920 = vmatmul.mubr.f32.vlgmr.msra.gmra.mrb[2].mxu0 %v3624_v9  ;;  %2411 = vmatmul.mubr.f32.vlgmr.msra.gmra.mrb[2].mxu1 %v3624_v9 }
 0x14a   : > { %2946 = vmatpush1.bf16.msra.mxu0 %v2925_v57  ;;  %2970 = vmatpush1.bf16.msra.mxu1 %v2949_v60 }
 0x14b   : > { %1994 = vmatprep.mubr.f32.mxu0 %v3321_v10  ;;  %2485 = vmatprep.mubr.f32.mxu1 %v3321_v10  ;;  %v2553_v10 = vrot.slane %v3798_v56, %v2503_v11  ;;  %v2573_v11 = vrot.slane %v3798_v56, %v2523_v20 }
 0x14d   : > { %v2590_v14 = vmul.f32 %v2553_v10, %v3614_v42  ;;  %v2596_v10 = vmul.f32 %v2577_v26, %v3614_v42 }
 0x14f   : > { %v2598_v58 = vadd.f32 %v2590_v14, %v2541_v50  ;;  %v2630_v14 = vrot.slane %v3814_v28, %v2523_v20 }
 0x151   : > { %1996 = vmatmul.mubr.f32.vlgmr.msra.gmra.mrb[2].mxu0 %v3624_v9  ;;  %2487 = vmatmul.mubr.f32.vlgmr.msra.gmra.mrb[2].mxu1 %v3624_v9  ;;  %v2561_v9 = vrot.slane %v3798_v56, %v2511_v13  ;;  %v2647_v46 = vadd.f32 %v2610_v62, %v2598_v58  ;;  %v2532_v13 = vrot.slane %v3796_v36, %v2531_v21 }
 0x152   : > { %v2626_v36 = vrot.slane %v3814_v28, %v2519_v51  ;;  %v2604_v56 = vadd.f32 %v2596_v10, %v2547_v3 }
 0x153   : > { %v2592_v15 = vmul.f32 %v2561_v9, %v3614_v42  ;;  %v2595_v9 = vmul.f32 %v2573_v11, %v3614_v42  ;;  %v2548_v8 = vmul.f32 %v2532_v13, %v3612_v41  ;;  %v2683_v42 = vrot.slane %v3825_v47, %v2519_v51 }
 0x154   : > { %v2651_v33 = vadd.f32 %v2626_v36, %v2602_v54  ;;  %v2653_v37 = vadd.f32 %v2634_v55, %v2604_v56 }
 0x155   : > { %v2600_v40 = vadd.f32 %v2592_v15, %v2543_v27  ;;  %v2603_v50 = vadd.f32 %v2595_v9, %v2546_v7  ;;  %v2605_v27 = vadd.f32 %v2597_v16, %v2548_v8  ;;  %v2638_v15 = vrot.slane %v3814_v28, %v2531_v21 }
 0x157   : > { %v2649_v48 = vadd.f32 %v2618_v43, %v2600_v40  ;;  %v2652_v38 = vadd.f32 %v2630_v14, %v2603_v50  ;;  %v2654_v41 = vadd.f32 %v2638_v15, %v2605_v27  ;;  %v2687_v40 = vrot.slane %v3825_v47, %v2523_v20 }
 0x158   : > { %v2695_v43 = vrot.slane %v3825_v47, %v2531_v21 }
 0x1f8   : > { %v1015_v32 = vpop.f32.mrb[0].mxu0  ;;  %v1506_v49 = vpop.f32.mrb[0].mxu1 }
 0x1f9   : > { %v2655_v53 = vmul.f32 %v2647_v46, %v1015_v32  ;;  %v2657_v57 = vmul.f32 %v2649_v48, %v1506_v49  ;;  %v1017_v60 = vpop.f32.mrb[1].mxu0  ;;  %v1508_v61 = vpop.f32.mrb[1].mxu1 }
 0x1fa   : > { %v2656_v0 = vmul.f32 %v2648_v29, %v1017_v60  ;;  %v2658_v1 = vmul.f32 %v2650_v30, %v1508_v61 }
 0x1fb   : > { %v2704_v2 = vadd.f32 %v2667_v44, %v2655_v53  ;;  %v2706_v4 = vadd.f32 %v2675_v31, %v2657_v57 }
 0x1fc   : > { %v2705_v5 = vadd.f32 %v2671_v24, %v2656_v0  ;;  %v2707_v6 = vadd.f32 %v2679_v34, %v2658_v1 }
 0x1fd   : > { %2712 = vst [vmem:[%s3833_s8] sm:$0xff] %v2704_v2  ;;  %2714 = vst [vmem:[%s3833_s8 + $0x10] sm:$0xff] %v2706_v4 }
 0x1fe   : > { %2713 = vst [vmem:[%s3833_s8 + $0x8] sm:$0xff] %v2705_v5  ;;  %2715 = vst [vmem:[%s3833_s8 + $0x18] sm:$0xff] %v2707_v6 }
 0x224   : > { %v1997_v58 = vpop.f32.mrb[2].mxu0  ;;  %v2488_v62 = vpop.f32.mrb[2].mxu1 }
 0x225   : > { %v2659_v12 = vmul.f32 %v2651_v33, %v1997_v58  ;;  %v2661_v28 = vmul.f32 %v2653_v37, %v2488_v62  ;;  %v1999_v18 = vpop.f32.mrb[3].mxu0  ;;  %v2490_v45 = vpop.f32.mrb[3].mxu1 }
 0x226   : > { %v2660_v22 = vmul.f32 %v2652_v38, %v1999_v18  ;;  %v2662_v46 = vmul.f32 %v2654_v41, %v2490_v45 }
 0x227   : > { %v2708_v48 = vadd.f32 %v2683_v42, %v2659_v12  ;;  %v2710_v29 = vadd.f32 %v2691_v39, %v2661_v28 }
 0x228   : > { %v2709_v30 = vadd.f32 %v2687_v40, %v2660_v22  ;;  %v2711_v44 = vadd.f32 %v2695_v43, %v2662_v46 }
 0x229   : > { %2716 = vst [vmem:[%s3833_s8 + $0x20] sm:$0xff] %v2708_v48  ;;  %2718 = vst [vmem:[%s3833_s8 + $0x30] sm:$0xff] %v2710_v29 }
 0x22a   : > { %2717 = vst [vmem:[%s3833_s8 + $0x28] sm:$0xff] %v2709_v30  ;;  %2719 = vst [vmem:[%s3833_s8 + $0x38] sm:$0xff] %v2711_v44 }
 0x22b   : > { %3236 = shalt.err (!%p3233_p0)
}
 0x22c   : > { %s3237_s6 = scalar_lea.hbm %s3872_s12, 1024  ;;  %s3241_s7 = scalar_lea.hbm %s3929_s4, 2048 }
 0x22d   : > { %p3238_p2 = scmp.ne.s32.totalorder %s3872_s12, %s3237_s6  ;;  %p3242_p10 = scmp.lt.u32.totalorder %s3872_s12, %s3929_s4 }
 0x22e   : > { %p3243_p11 = scmp.lt.u32.totalorder %s3241_s7, %s3237_s6  ;;  %p3245_p13 = scmp.lt.u32.totalorder %s3237_s6, %s3872_s12 }
 0x22f   : > { %p3239_p4 = pnand %p3238_p2, %p3944_p1 }
 0x230   : > { %p3244_p3 = por %p3243_p11, %p3242_p10 }
 0x231   : > { %p3240_p8 = pneg %p3239_p4 }
 0x232   : > { %p3246_p5 = por %p3245_p13, %p3244_p3 }
 0x234   : > { %p3247_p6 = pnand %p3246_p5, %p3240_p8 }
 0x236   : > { %3250 = shalt.err (!%p3247_p6)
}
 0x237   : > { %3031 = dma.vmem_to_hbm [thread:$0]  (%p3944_p1), %s3874_s13, 1024, %s3872_s12, %s2721_s18  }
 0x238 PF: > { %p3058_p7 = scmp.ge.s32.totalorder %s3313_s20, 2  ;;  %s2749_s5 = sand.u32 1, %s3293_s15  }
 0x239   : > { %p3945_p9 = scmp.ne.s32.totalorder %s3936_s27, 0  ;;  %s2750_s8 = scalar_lea.sflag [#allocation4], %s2749_s5 }
 0x23b   : > { %p3047_p12 = pnand %p3058_p7, %p3945_p9 }
 0x23d   : > { %3288 = dma.done.wait (!%p3047_p12), %s2750_s8, 1024  }
 0x23e   : > { %3290 = vsyncadd (!%p3047_p12), %s2750_s8, 4294966272  ;;  %s20_s20 = sadd.s32 1, %s3313_s20   ;;  %s3946_s15 = smov %s3297_s16 }
 0x23f   : > { %p17_p0 = scmp.ge.s32.totalorder %s20_s20, 4   ;;  %s3947_s16 = smov %s3301_s17 }
 0x240   : > { %s3948_s17 = smov %s3407_s28  ;;  %s3949_s18 = smov %s3309_s19 }
 0x241   : > { %s3950_s19 = smov %s3952_s23  ;;  %19 = sbr.rel (!%p17_p0) target bundleno = 9 (0x9), region = 91 }
 0x248   :  { %2755 = vsyncpa [#allocation3], 1 }
 0x249   :  { %2757 = vsyncpa [#allocation3 + $0x1], 1 }
 0x24a   :  { %2758 = vsyncpa [#allocation8], 1 }
 0x24b   :  { %2759 = vsyncpa [#allocation4], 1 }
 0x24c   :  { %2761 = vsyncpa [#allocation4 + $0x1], 1 }
 0x24d   :  { %2762 = vsyncpa [#allocation5], 1 }
 0x24e   :  { %2764 = vsyncpa [#allocation5 + $0x1], 1 }

</bundles_post_ra>
